<compile_context>
chip_gen: v7x
topology: tpu7x:2x2x1
jax: 0.10.0
libtpu: 0.0.40
codegen_flags: <defaults>
</compile_context>

<pallas_src>
import jax
import jax.numpy as jnp
from jax.experimental import pallas as pl
from jax.experimental.pallas import tpu as pltpu


# ----------------------------------------------------------------------------
# Pallas kernel: identity / pass-through.
# ----------------------------------------------------------------------------
def _identity_kernel(x_ref, o_ref):
    o_ref[...] = x_ref[...]


def _round_up(n: int, m: int) -> int:
    return ((n + m - 1) // m) * m


def identity_forward(x: jax.Array,
                     *,
                     lane_width: int = 1024,
                     target_block_bytes: int = 2 << 20) -> jax.Array:
    """Lane-dense, large-tile pass-through Pallas kernel.

    Any-shape input is flattened and viewed as (rows, lane_width) with
    lane_width a multiple of 128 lanes, zero-padded so rows divides the row
    tile.  Blocks target ~target_block_bytes so the kernel is HBM-bandwidth
    bound rather than per-grid-step-overhead bound.
    """
    assert lane_width % 128 == 0, "last dim must be a multiple of 128 lanes"
    orig_shape = x.shape
    dtype = x.dtype
    total = x.size
    itemsize = jnp.dtype(dtype).itemsize

    L = lane_width
    rows = _round_up(total, L) // L

    # Row tile: ~target_block_bytes per block, a multiple of 32 sublanes so the
    # block is unpadded for f32 (8,128), bf16 (16,128) and int8/fp8 (32,128).
    desired = max(32, (target_block_bytes // (L * itemsize)) // 32 * 32)
    if rows <= desired:
        row_tile = rows            # single block; full-extent block is always legal
    else:
        row_tile = desired
        rows = _round_up(rows, row_tile)

    padded_len = rows * L
    flat = x.reshape(-1)
    pad = padded_len - total
    if pad:
        flat = jnp.pad(flat, (0, pad))
    x2d = flat.reshape(rows, L)

    grid = (pl.cdiv(rows, row_tile),)
    out2d = pl.pallas_call(
        _identity_kernel,
        out_shape=jax.ShapeDtypeStruct((rows, L), dtype),
        grid=grid,
        in_specs=[pl.BlockSpec((row_tile, L), lambda i: (i, 0))],
        out_specs=pl.BlockSpec((row_tile, L), lambda i: (i, 0)),
        # Identity: alias input -> output so XLA can elide the extra buffer
        # (and the copy entirely when the caller donates the input).
        input_output_aliases={0: 0},
        compiler_params=pltpu.CompilerParams(
            dimension_semantics=("parallel",),
            # in + out blocks x 2 pipeline buffers of ~2 MiB each << 32 MiB;
            # raises v5e's 16 MiB scoped default, safe within v7x's 64 MiB VMEM.
            vmem_limit_bytes=32 << 20,
        ),
    )(x2d)

    out = out2d.reshape(-1)
    if pad:
        out = out[:total]
    return out.reshape(orig_shape)


# ----------------------------------------------------------------------------
# BaseModel: faithful (JAX-side) reproduction of the abstract interface.
# ----------------------------------------------------------------------------
class BaseModel:
    def __init__(self):
        # nn.Module.__init__ with no parameters -> nothing to initialize.
        pass

    def forward(self, *args, **kwargs):
        # Exact semantics of the PyTorch module's forward().
        raise NotImplementedError

    def get_loss(self, *args, **kwargs):
        raise NotImplementedError

    # Representative kernel path a concrete subclass would override / use.
    def _identity_pallas(self, x):
        return identity_forward(x)


if __name__ == "__main__":
    key = jax.random.PRNGKey(0)
    model = BaseModel()

    # 1) forward() must raise NotImplementedError, exactly like the PyTorch base.
    raised = False
    try:
        model.forward()
    except NotImplementedError:
        raised = True
    assert raised, "BaseModel.forward must raise NotImplementedError"

    # 2) Small NCHW example (flattens to a single lane-dense block, no padding).
    x = jax.random.normal(key, (2, 4, 16, 16), dtype=jnp.float32)
    y = jax.block_until_ready(model._identity_pallas(x))
    assert y.shape == x.shape and y.dtype == x.dtype
    assert bool(jnp.array_equal(y, x))

    # 3) Element count not a multiple of the lane width (exercises zero-padding).
    k1, k2 = jax.random.split(key)
    x_odd = jax.random.normal(k1, (3, 5, 30, 50), dtype=jnp.float32)
    y_odd = jax.block_until_ready(identity_forward(x_odd))
    assert y_odd.shape == x_odd.shape
    assert bool(jnp.array_equal(y_odd, x_odd))

    # 4) Larger array spanning multiple (512, 1024) blocks (multi-step grid).
    x_big = jax.random.normal(k2, (1, 2, 600, 1024), dtype=jnp.float32)
    y_big = jax.block_until_ready(identity_forward(x_big))
    assert y_big.shape == x_big.shape
    assert bool(jnp.array_equal(y_big, x_big))

    print("KERNEL_OK")
</pallas_src>

<mosaic_0001>
module attributes {stable_mosaic.version = 11 : i64} {
  func.func @_identity_kernel(%arg0: i32, %arg1: memref<2x1024xf32, #tpu.memory_space<vmem>>, %arg2: memref<2x1024xf32, #tpu.memory_space<vmem>>) attributes {dimension_semantics = [#tpu.dimension_semantics<parallel>], iteration_bounds = array<i64: 1>, scalar_prefetch = 0 : i64, scratch_operands = 0 : i64, tpu.core_type = #tpu.core_type<tc>, window_params = [{transform_indices = @transform_0, window_bounds = array<i64: 2, 1024>}, {transform_indices = @transform_1, window_bounds = array<i64: 2, 1024>}]} {
    %c0 = arith.constant 0 : index
    %c0_0 = arith.constant 0 : index
    %0 = vector.load %arg1[%c0, %c0_0] : memref<2x1024xf32, #tpu.memory_space<vmem>>, vector<2x1024xf32>
    %c0_1 = arith.constant 0 : index
    %c0_2 = arith.constant 0 : index
    %1 = vector.load %arg2[%c0_1, %c0_2] : memref<2x1024xf32, #tpu.memory_space<vmem>>, vector<2x1024xf32>
    tpu.vector_store %arg2[%c0_1, %c0_2], %0 {strides = array<i32>} : memref<2x1024xf32, #tpu.memory_space<vmem>>, vector<2x1024xf32>,
    return
  }
  func.func @transform_0(%arg0: i32) -> (i32, i32) {
    %c0_i32 = arith.constant 0 : i32
    %c0_i32_0 = arith.constant 0 : i32
    return %arg0, %c0_i32 : i32, i32
  }
  func.func @transform_1(%arg0: i32) -> (i32, i32) {
    %c0_i32 = arith.constant 0 : i32
    %c0_i32_0 = arith.constant 0 : i32
    return %arg0, %c0_i32 : i32, i32
  }
}

</mosaic_0001>

<bundles_post_ra>
// kernel: tpu_custom_call.1
= control target key start
LH: loop header
LB: loop body
LE: loop exit
PB: predicated region body
PF: predicated region fallthrough
CT: control target
= control target key end

     0   :  { %6 = vsyncpa [#allocation3], 0  ;;  %s126_s0 = inlined_call_operand.hbm [shape: f32[2,1024], index: 0, kind: input, shape index: {}, may-alias: {0,1}]   ;;  %s127_s1 = inlined_call_operand.hbm [shape: f32[2,1024], index: 1, kind: output, shape index: {}, may-alias: {0,1}]  }
   0x1   :  { %7 = vsyncpa [#allocation4], 0  ;;  %s90_s6 = smov [#allocation2]   ;;  %s42_s10 = scalar_lea.hbm %s126_s0, 256 }
   0x2   :  { %s14_s7 = sshll.u32 %s90_s6, 4  ;;  %p43_p0 = scmp.ne.s32.totalorder %s126_s0, %s42_s10  ;;  %s15_s7 = int_to_ptr.vmem [resolvable:$true] %s14_s7 }
   0x3   :  { %p46_p1 = scmp.lt.u32.totalorder %s42_s10, %s126_s0 }
   0x5   :  { %p48_p2 = pnand %p46_p1, %p43_p0 }
   0x7   :  { %51 = shalt.err (!%p48_p2)
}
   0x8   :  { %s52_s15 = scalar_lea.vmem %s15_s7, 256  ;;  %p57_p4 = scmp.lt.s32.totalorder %s15_s7, %s15_s7 }
   0x9   :  { %p53_p3 = scmp.ne.s32.totalorder %s15_s7, %s52_s15  ;;  %p58_p5 = scmp.lt.s32.totalorder %s52_s15, %s52_s15 }
   0xb   :  { %p59_p6 = por %p58_p5, %p57_p4 }
   0xd   :  { %p60_p7 = pnand %p59_p6, %p53_p3 }
   0xf   :  { %63 = shalt.err (!%p60_p7)
}
  0x10   :  { %17 = dma.hbm_to_vmem [thread:$0]  %s126_s0, 256, %s15_s7, [#allocation3]  }
  0x11   :  { %86 = dma.done.wait [#allocation3], 256  }
  0x12   :  { %87 = vsyncadd [#allocation3], 4294967040  ;;  %s91_s18 = smov [#allocation5]   ;;  %v21_v0 = vld [vmem:[#allocation2] sm:$0xff]  ;;  %v22_v1 = vld [vmem:[#allocation2 + $0x8] sm:$0xff] }
  0x13   :  { %s31_s19 = sshll.u32 %s91_s18, 4  ;;  %23 = vst [vmem:[#allocation5] sm:$0xff] %v21_v0  ;;  %24 = vst [vmem:[#allocation5 + $0x8] sm:$0xff] %v22_v1  ;;  %s32_s19 = int_to_ptr.vmem [resolvable:$true] %s31_s19 }
  0x14   :  { %s64_s20 = scalar_lea.vmem %s32_s19, 256  ;;  %p69_p9 = scmp.lt.s32.totalorder %s32_s19, %s32_s19 }
  0x15   :  { %p65_p8 = scmp.ne.s32.totalorder %s32_s19, %s64_s20  ;;  %p70_p10 = scmp.lt.s32.totalorder %s64_s20, %s64_s20 }
  0x17   :  { %p71_p11 = por %p70_p10, %p69_p9 }
  0x19   :  { %p72_p12 = pnand %p71_p11, %p65_p8 }
  0x1b   :  { %75 = shalt.err (!%p72_p12)
}
  0x1c   :  { %s76_s0 = scalar_lea.hbm %s127_s1, 256 }
  0x1d   :  { %p77_p13 = scmp.ne.s32.totalorder %s127_s1, %s76_s0  ;;  %p80_p0 = scmp.lt.u32.totalorder %s76_s0, %s127_s1 }
  0x1f   :  { %p82_p1 = pnand %p80_p0, %p77_p13 }
  0x21   :  { %85 = shalt.err (!%p82_p1)
}
  0x22   :  { %34 = dma.vmem_to_hbm [thread:$0]  %s32_s19, 256, %s127_s1, [#allocation4]  }
  0x23   :  { %88 = dma.done.wait [#allocation4], 256  }
  0x24   :  { %89 = vsyncadd [#allocation4], 4294967040 }
  0x25   :  { %38 = vsyncpa [#allocation3], 1 }
  0x26   :  { %39 = vsyncpa [#allocation4], 1 }

</bundles_post_ra>
